<compile_context>
chip_gen: v7x
topology: tpu7x:2x2x1
jax: 0.10.0
libtpu: 0.0.40
codegen_flags: <defaults>
</compile_context>

<pallas_src>
import functools

import jax
import jax.numpy as jnp
from jax.experimental import pallas as pl
from jax.experimental.pallas import tpu as pltpu


def _round_up(x, m):
    return ((x + m - 1) // m) * m


def _linear_concat_kernel(x_ref, w_ref, b_ref, out_ref, acc_ref):
    """One (row-tile, col-tile, layer) grid step of concat+linear.

    x_ref   : (tm, Dp)   rows of hidden state for layer `layer`  (bf16)
    w_ref   : (Dp, tn)   transposed weight slice for (layer, col-tile) (bf16)
    b_ref   : (1, tn)    bias slice for the col-tile (f32)
    out_ref : (tm, tn)   output tile (f32), written on the last layer step
    acc_ref : (tm, tn)   f32 VMEM accumulator, resident across the layer axis
    """
    layer = pl.program_id(2)

    @pl.when(layer == 0)
    def _init():
        acc_ref[...] = jnp.zeros_like(acc_ref)

    acc_ref[...] += jnp.dot(x_ref[...], w_ref[...],
                            preferred_element_type=jnp.float32)

    @pl.when(layer == pl.num_programs(2) - 1)
    def _finalize():
        out_ref[...] = (acc_ref[...] + b_ref[...]).astype(out_ref.dtype)


@functools.partial(
    jax.jit,
    static_argnames=("k", "l", "tm", "tn", "matmul_dtype", "vmem_limit_bytes"))
def linear_all_concat_extract(hidden_states, weight, bias, *, k, l,
                              tm=256, tn=512, matmul_dtype=jnp.bfloat16,
                              vmem_limit_bytes=None):
    """hidden_states: tuple of L arrays (B, T, Dp) (all same Dp);
    weight: (k*l, L*Dp)  -- torch nn.Linear layout (out_features, in_features);
    bias:   (k*l,).
    Returns (taste_logits (B, T, l, k) float32, training_info = {})."""
    L = len(hidden_states)
    B, T, Dp = hidden_states[0].shape
    d_out = k * l
    assert weight.shape == (d_out, L * Dp)
    N = B * T

    # torch.cat(hidden_states, dim=-1): the concat axis becomes the kernel's reduction
    # grid axis, so we only stack to (L, N, Dp) here (same materialization cost as cat).
    x = jnp.stack(
        [h.reshape(N, Dp).astype(matmul_dtype) for h in hidden_states], axis=0)

    # Parameter prep.  For inference with fixed weights these should be hoisted to
    # parameter-load time (pre-transposed / pre-cast) rather than done per call.
    w_t = jnp.transpose(weight).reshape(L, Dp, d_out).astype(matmul_dtype)
    b2d = bias.astype(jnp.float32).reshape(1, d_out)

    # Row tiling: MXU-friendly tile, padded row axis instead of a divisibility assert.
    tm_eff = max(8, min(tm, _round_up(N, 8)))
    n_pad = _round_up(N, tm_eff)
    if n_pad != N:
        x = jnp.pad(x, ((0, 0), (0, n_pad - N), (0, 0)))

    # Column tiling: keep tiles lane-dense (multiple of 128 when d_out allows it) and pad
    # the output-column axis to a tile multiple.
    tn_eff = min(tn, _round_up(d_out, 128))
    d_out_pad = _round_up(d_out, tn_eff)
    if d_out_pad != d_out:
        w_t = jnp.pad(w_t, ((0, 0), (0, 0), (0, d_out_pad - d_out)))
        b2d = jnp.pad(b2d, ((0, 0), (0, d_out_pad - d_out)))

    grid = (n_pad // tm_eff, d_out_pad // tn_eff, L)  # reduction (layer) axis last

    out = pl.pallas_call(
        _linear_concat_kernel,
        out_shape=jax.ShapeDtypeStruct((n_pad, d_out_pad), jnp.float32),
        grid_spec=pltpu.PrefetchScalarGridSpec(
            num_scalar_prefetch=0,
            grid=grid,
            in_specs=[
                # None => layer dim squeezed out of the kernel ref
                pl.BlockSpec((None, tm_eff, Dp), lambda i, j, layer: (layer, i, 0)),
                pl.BlockSpec((None, Dp, tn_eff), lambda i, j, layer: (layer, 0, j)),
                pl.BlockSpec((1, tn_eff), lambda i, j, layer: (0, j)),
            ],
            out_specs=pl.BlockSpec((tm_eff, tn_eff), lambda i, j, layer: (i, j)),
            scratch_shapes=[pltpu.VMEM((tm_eff, tn_eff), jnp.float32)],
        ),
        compiler_params=pltpu.CompilerParams(
            dimension_semantics=("parallel", "parallel", "arbitrary"),
            vmem_limit_bytes=vmem_limit_bytes,
        ),
    )(x, w_t, b2d)

    taste_logits = out[:N, :d_out].reshape(B, T, l, k)
    training_info = {}
    return taste_logits, training_info


def _reference_f32(hidden_states, weight, bias, k, l):
    """Plain-JAX f32 reference of the module forward."""
    h = jnp.concatenate([hs.astype(jnp.float32) for hs in hidden_states], axis=-1)
    B, T, _ = h.shape
    flat = h @ weight.astype(jnp.float32).T + bias.astype(jnp.float32)
    return flat.reshape(B, T, l, k)


def _reference_matched(hidden_states, weight, bias, k, l, dtype):
    """Reference with the same bf16 operand rounding as the kernel (f32 accumulation)."""
    h = jnp.concatenate([hs.astype(dtype) for hs in hidden_states], axis=-1)
    B, T, _ = h.shape
    flat = jnp.dot(h, weight.astype(dtype).T,
                   preferred_element_type=jnp.float32) + bias.astype(jnp.float32)
    return flat.reshape(B, T, l, k)


if __name__ == "__main__":
    # Small shapes consistent with the module: L hidden states of per-layer dim Dp are
    # concatenated and mapped by nn.Linear(L*Dp, k*l).  Real config: L=29, Dp=3072, k=512, l=4.
    B, T = 2, 8
    L, Dp = 4, 128          # 4 hidden states of dim 128 -> concat dim 512
    k, l = 128, 4           # output dim k*l = 512

    key = jax.random.PRNGKey(0)
    k_hs, k_w, k_b = jax.random.split(key, 3)
    hs_keys = jax.random.split(k_hs, L)

    hidden_states = tuple(
        jax.random.normal(hk, (B, T, Dp), dtype=jnp.float32) for hk in hs_keys)
    weight = 0.02 * jax.random.normal(k_w, (k * l, L * Dp), dtype=jnp.float32)
    bias = 0.01 * jax.random.normal(k_b, (k * l,), dtype=jnp.float32)

    taste_logits, training_info = linear_all_concat_extract(
        hidden_states, weight, bias, k=k, l=l)
    jax.block_until_ready(taste_logits)

    assert taste_logits.shape == (B, T, l, k)
    assert training_info == {}

    # Tight check vs a reference with matching bf16 operand rounding.
    ref_matched = _reference_matched(hidden_states, weight, bias, k, l, jnp.bfloat16)
    assert jnp.allclose(taste_logits, ref_matched, atol=1e-3, rtol=1e-3)

    # Loose check vs the pure-f32 module semantics (bf16 MXU feed tolerance).
    ref_f32 = _reference_f32(hidden_states, weight, bias, k, l)
    assert jnp.allclose(taste_logits, ref_f32, atol=5e-2, rtol=5e-2)

    print("KERNEL_OK")
</pallas_src>

<mosaic_0001>
module attributes {stable_mosaic.version = 11 : i64} {
  func.func @_linear_concat_kernel(%arg0: i32, %arg1: i32, %arg2: i32, %arg3: memref<1x16x128xbf16, #tpu.memory_space<vmem>>, %arg4: memref<1x128x512xbf16, #tpu.memory_space<vmem>>, %arg5: memref<1x512xf32, #tpu.memory_space<vmem>>, %arg6: memref<16x512xf32, #tpu.memory_space<vmem>>, %arg7: memref<16x512xf32, #tpu.memory_space<vmem>>) attributes {dimension_semantics = [#tpu.dimension_semantics<parallel>, #tpu.dimension_semantics<parallel>, #tpu.dimension_semantics<arbitrary>], iteration_bounds = array<i64: 1, 1, 4>, scalar_prefetch = 0 : i64, scratch_operands = 1 : i64, tpu.core_type = #tpu.core_type<tc>, window_params = [{transform_indices = @transform_0, window_bounds = array<i64: 1, 16, 128>}, {transform_indices = @transform_1, window_bounds = array<i64: 1, 128, 512>}, {transform_indices = @transform_2, window_bounds = array<i64: 1, 512>}, {transform_indices = @transform_3, window_bounds = array<i64: 16, 512>}]} {
    %c0_i32 = arith.constant 0 : i32
    %0 = arith.cmpi eq, %arg2, %c0_i32 : i32
    %1 = arith.extui %0 : i1 to i32
    %c0_i32_0 = arith.constant 0 : i32
    %2 = arith.cmpi ne, %1, %c0_i32_0 : i32
    scf.if %2 {
      %cst_11 = arith.constant 0.000000e+00 : f32
      %14 = vector.broadcast %cst_11 : f32 to vector<16x512xf32>
      %c0_12 = arith.constant 0 : index
      %c0_13 = arith.constant 0 : index
      %15 = vector.load %arg7[%c0_12, %c0_13] : memref<16x512xf32, #tpu.memory_space<vmem>>, vector<16x512xf32>
      tpu.vector_store %arg7[%c0_12, %c0_13], %14 {strides = array<i32>} : memref<16x512xf32, #tpu.memory_space<vmem>>, vector<16x512xf32>,
    } else {
    }
    %c0 = arith.constant 0 : index
    %c0_1 = arith.constant 0 : index
    %3 = vector.load %arg7[%c0, %c0_1] : memref<16x512xf32, #tpu.memory_space<vmem>>, vector<16x512xf32>
    %c0_2 = arith.constant 0 : index
    %c0_3 = arith.constant 0 : index
    %c0_4 = arith.constant 0 : index
    %4 = vector.load %arg3[%c0_2, %c0_3, %c0_4] : memref<1x16x128xbf16, #tpu.memory_space<vmem>>, vector<1x16x128xbf16>
    %5 = vector.shape_cast %4 : vector<1x16x128xbf16> to vector<16x128xbf16>
    %c0_5 = arith.constant 0 : index
    %c0_6 = arith.constant 0 : index
    %c0_7 = arith.constant 0 : index
    %6 = vector.load %arg4[%c0_5, %c0_6, %c0_7] : memref<1x128x512xbf16, #tpu.memory_space<vmem>>, vector<1x128x512xbf16>
    %7 = vector.shape_cast %6 : vector<1x128x512xbf16> to vector<128x512xbf16>
    %cst = arith.constant dense<0.000000e+00> : vector<16x512xf32>
    %8 = tpu.matmul %5, %7, %cst {dimension_numbers = #tpu.dot_dimension_numbers<[1], [0], [0], [1], [0, 0, 1, 1], [], []>} : vector<16x128xbf16>, vector<128x512xbf16>, vector<16x512xf32> -> vector<16x512xf32>
    %9 = arith.addf %3, %8 : vector<16x512xf32>
    %c0_8 = arith.constant 0 : index
    %c0_9 = arith.constant 0 : index
    %10 = vector.load %arg7[%c0_8, %c0_9] : memref<16x512xf32, #tpu.memory_space<vmem>>, vector<16x512xf32>
    tpu.vector_store %arg7[%c0_8, %c0_9], %9 {strides = array<i32>} : memref<16x512xf32, #tpu.memory_space<vmem>>, vector<16x512xf32>,
    %c3_i32 = arith.constant 3 : i32
    %11 = arith.cmpi eq, %arg2, %c3_i32 : i32
    %12 = arith.extui %11 : i1 to i32
    %c0_i32_10 = arith.constant 0 : i32
    %13 = arith.cmpi ne, %12, %c0_i32_10 : i32
    scf.if %13 {
      %c0_11 = arith.constant 0 : index
      %c0_12 = arith.constant 0 : index
      %14 = vector.load %arg7[%c0_11, %c0_12] : memref<16x512xf32, #tpu.memory_space<vmem>>, vector<16x512xf32>
      %c0_13 = arith.constant 0 : index
      %c0_14 = arith.constant 0 : index
      %15 = vector.load %arg5[%c0_13, %c0_14] : memref<1x512xf32, #tpu.memory_space<vmem>>, vector<1x512xf32>
      %16 = vector.broadcast %15 : vector<1x512xf32> to vector<16x512xf32>
      %17 = arith.addf %14, %16 : vector<16x512xf32>
      %c0_15 = arith.constant 0 : index
      %c0_16 = arith.constant 0 : index
      %18 = vector.load %arg6[%c0_15, %c0_16] : memref<16x512xf32, #tpu.memory_space<vmem>>, vector<16x512xf32>
      tpu.vector_store %arg6[%c0_15, %c0_16], %17 {strides = array<i32>} : memref<16x512xf32, #tpu.memory_space<vmem>>, vector<16x512xf32>,
    } else {
    }
    return
  }
  func.func @transform_0(%arg0: i32, %arg1: i32, %arg2: i32) -> (i32, i32, i32) {
    %c0_i32 = arith.constant 0 : i32
    %c0_i32_0 = arith.constant 0 : i32
    return %arg2, %arg0, %c0_i32 : i32, i32, i32
  }
  func.func @transform_1(%arg0: i32, %arg1: i32, %arg2: i32) -> (i32, i32, i32) {
    %c0_i32 = arith.constant 0 : i32
    %c0_i32_0 = arith.constant 0 : i32
    return %arg2, %c0_i32, %arg1 : i32, i32, i32
  }
  func.func @transform_2(%arg0: i32, %arg1: i32, %arg2: i32) -> (i32, i32) {
    %c0_i32 = arith.constant 0 : i32
    %c0_i32_0 = arith.constant 0 : i32
    return %c0_i32, %arg1 : i32, i32
  }
  func.func @transform_3(%arg0: i32, %arg1: i32, %arg2: i32) -> (i32, i32) {
    %c0_i32 = arith.constant 0 : i32
    return %arg0, %arg1 : i32, i32
  }
}

</mosaic_0001>

<bundles_post_ra>
// kernel: linear_all_concat_extract.1
= control target key start
LH: loop header
LB: loop body
LE: loop exit
PB: predicated region body
PF: predicated region fallthrough
CT: control target
= control target key end

     0   :  { %s939_s12 = smov 0   ;;  %s941_s13 = smov 0   ;;  %s1042_s0 = inlined_call_operand.vmem [shape: bf16[4,16,128], index: 0, kind: input, shape index: {}]   ;;  %s1043_s1 = inlined_call_operand.vmem [shape: bf16[4,128,512], index: 1, kind: input, shape index: {}]   ;;  %s1044_s2 = inlined_call_operand.vmem [shape: f32[1,512], index: 2, kind: input, shape index: {}]   ;;  %s1045_s3 = inlined_call_operand.vmem [shape: f32[16,512], index: 3, kind: output, shape index: {}]  }
   0x1   :  { %s943_s14 = smov 0  }
   0x2 LB: > { %s25_s15 = sadd.s32 1, %s911_s13  ;;  %p772_p0 = scmp.ge.s32.totalorder %s915_s14, 1  ;;  %s915_s14 = sphi %s943_s14, %s13_s14   ;;  %s911_s13 = sphi %s941_s13, %s1047_s13   ;;  %s907_s12 = sphi %s939_s12, %s1046_s12  }
   0x3   : > { %p26_p1 = scmp.ge.s32.totalorder %s25_s15, 4  ;;  %p192_p2 = scmp.lt.s32.totalorder %s915_s14, 5 }
   0x5   : > { %s1049_s15 = smov (%p26_p1, %s25_s15), 0  ;;  %p193_p3 = pnand %p772_p0, %p192_p2 }
   0x6   : > { %p239_p4 = scmp.lt.s32.totalorder (!%p193_p3), %s907_s12, 3  ;;  %p777_p5 = scmp.ne.s32.totalorder (!%p193_p3), %s907_s12, 0 }
   0x7   : > { %196 = sbr.rel (%p193_p3) target bundleno = 284 (0x11c), region = 32 }
   0xe   : > { %s240_s16 = scalar_select %p239_p4, %s907_s12, 3 }
   0xf   : > { %279 = sbr.rel (%p777_p5) target bundleno = 22 (0x16), region = 36  ;;  %v917_v0 = vmov (!%p777_p5), 0.0  }
  0x10   : > { %s816_s17 = sshll.u32 %s240_s16, 3  ;;  %s817_s18 = sshll.u32 %s240_s16, 8  ;;  %280 = vst [vmem:[#allocation2] sm:$0xff] (!%p777_p5), %v917_v0  ;;  %281 = vst [vmem:[#allocation2 + $0x8] sm:$0xff] (!%p777_p5), %v917_v0 }
  0x11   : > { %s964_s21 = scalar_lea.vmem %s1042_s0, %s816_s17  ;;  %s969_s24 = scalar_lea.vmem %s1043_s1, %s817_s18  ;;  %282 = vst [vmem:[#allocation2 + $0x10] sm:$0xff] (!%p777_p5), %v917_v0  ;;  %283 = vst [vmem:[#allocation2 + $0x18] sm:$0xff] (!%p777_p5), %v917_v0 }
  0x12   : > { %284 = vst [vmem:[#allocation2 + $0x20] sm:$0xff] (!%p777_p5), %v917_v0  ;;  %285 = vst [vmem:[#allocation2 + $0x28] sm:$0xff] (!%p777_p5), %v917_v0 }
  0x13   : > { %286 = vst [vmem:[#allocation2 + $0x30] sm:$0xff] (!%p777_p5), %v917_v0  ;;  %287 = vst [vmem:[#allocation2 + $0x38] sm:$0xff] (!%p777_p5), %v917_v0 }
  0x16 PF: > { %v844_v1 = vld [vmem:[%s969_s24 + $0x4] ss:$16 sps:$4 sm:$0xff]   ;;  %v846_v2 = vld [vmem:[%s969_s24 + $0xc] ss:$16 sps:$4 sm:$0xff]   ;;  %v918_v3 = vmov 0   ;;  %p811_p6 = scmp.ne.s32.totalorder %s907_s12, 3 }
  0x17   : > { %528 = vmatprep.mubr.bf16.mxu0 %v918_v3  ;;  %571 = vmatprep.mubr.bf16.mxu1 %v918_v3  ;;  %v848_v4 = vld [vmem:[%s969_s24] ss:$16 sps:$4 sm:$0xff]   ;;  %v849_v5 = vld [vmem:[%s969_s24 + $0x8] ss:$16 sps:$4 sm:$0xff]   ;;  %v850_v6 = vld [vmem:[%s969_s24 + $0x24] ss:$16 sps:$4 sm:$0xff]   ;;  %v612_v59 = vlaneseq (!%p811_p6) }
  0x18   : > { %496 = vmatprep.subr.bf16.mxu0 %v844_v1  ;;  %539 = vmatprep.subr.bf16.mxu1 %v846_v2  ;;  %v852_v7 = vld [vmem:[%s969_s24 + $0x2c] ss:$16 sps:$4 sm:$0xff]   ;;  %v854_v8 = vld [vmem:[%s969_s24 + $0x20] ss:$16 sps:$4 sm:$0xff]   ;;  %v855_v9 = vld [vmem:[%s969_s24 + $0x28] ss:$16 sps:$4 sm:$0xff]  }
  0x19   : > { %497 = vmatpush1.bf16.msra.mxu0 %v848_v4  ;;  %540 = vmatpush1.bf16.msra.mxu1 %v849_v5  ;;  %v856_v10 = vld [vmem:[%s969_s24 + $0x44] ss:$16 sps:$4 sm:$0xff]   ;;  %v858_v11 = vld [vmem:[%s969_s24 + $0x4c] ss:$16 sps:$4 sm:$0xff]   ;;  %v860_v12 = vld [vmem:[%s969_s24 + $0x40] ss:$16 sps:$4 sm:$0xff]  }
  0x1a   : > { %498 = vmatprep.subr.bf16.mxu0 %v850_v6  ;;  %541 = vmatprep.subr.bf16.mxu1 %v852_v7  ;;  %v861_v13 = vld [vmem:[%s969_s24 + $0x48] ss:$16 sps:$4 sm:$0xff]   ;;  %v862_v14 = vld [vmem:[%s969_s24 + $0x64] ss:$16 sps:$4 sm:$0xff]   ;;  %v864_v15 = vld [vmem:[%s969_s24 + $0x6c] ss:$16 sps:$4 sm:$0xff]  }
  0x1b   : > { %v866_v16 = vld [vmem:[%s969_s24 + $0x60] ss:$16 sps:$4 sm:$0xff]   ;;  %v867_v17 = vld [vmem:[%s969_s24 + $0x68] ss:$16 sps:$4 sm:$0xff]   ;;  %v868_v18 = vld [vmem:[%s969_s24 + $0x84] ss:$16 sps:$4 sm:$0xff]  }
  0x1c   : > { %v870_v19 = vld [vmem:[%s969_s24 + $0x8c] ss:$16 sps:$4 sm:$0xff]   ;;  %v872_v20 = vld [vmem:[%s969_s24 + $0x80] ss:$16 sps:$4 sm:$0xff]   ;;  %v873_v21 = vld [vmem:[%s969_s24 + $0x88] ss:$16 sps:$4 sm:$0xff]  }
  0x1d   : > { %499 = vmatpush1.bf16.msra.mxu0 %v854_v8  ;;  %542 = vmatpush1.bf16.msra.mxu1 %v855_v9  ;;  %v874_v22 = vld [vmem:[%s969_s24 + $0xa4] ss:$16 sps:$4 sm:$0xff]   ;;  %v876_v23 = vld [vmem:[%s969_s24 + $0xac] ss:$16 sps:$4 sm:$0xff]   ;;  %v878_v24 = vld [vmem:[%s969_s24 + $0xa0] ss:$16 sps:$4 sm:$0xff]  }
  0x1e   : > { %500 = vmatprep.subr.bf16.mxu0 %v856_v10  ;;  %543 = vmatprep.subr.bf16.mxu1 %v858_v11  ;;  %v879_v25 = vld [vmem:[%s969_s24 + $0xa8] ss:$16 sps:$4 sm:$0xff]   ;;  %v880_v26 = vld [vmem:[%s969_s24 + $0xc4] ss:$16 sps:$4 sm:$0xff]   ;;  %v882_v27 = vld [vmem:[%s969_s24 + $0xcc] ss:$16 sps:$4 sm:$0xff]  }
  0x1f   : > { %v884_v28 = vld [vmem:[%s969_s24 + $0xc0] ss:$16 sps:$4 sm:$0xff]   ;;  %v885_v29 = vld [vmem:[%s969_s24 + $0xc8] ss:$16 sps:$4 sm:$0xff]   ;;  %v886_v30 = vld [vmem:[%s969_s24 + $0xe4] ss:$16 sps:$4 sm:$0xff]  }
  0x20   : > { %v888_v31 = vld [vmem:[%s969_s24 + $0xec] ss:$16 sps:$4 sm:$0xff]   ;;  %v890_v32 = vld [vmem:[%s969_s24 + $0xe0] ss:$16 sps:$4 sm:$0xff]   ;;  %v891_v33 = vld [vmem:[%s969_s24 + $0xe8] ss:$16 sps:$4 sm:$0xff]  }
  0x21   : > { %501 = vmatpush1.bf16.msra.mxu0 %v860_v12  ;;  %544 = vmatpush1.bf16.msra.mxu1 %v861_v13  ;;  %v892_v34 = vld [vmem:[%s964_s21] sm:$0xff]   ;;  %v290_v36 = vld [vmem:[#allocation2 + $0x10] sm:$0xff]  ;;  %v289_v37 = vld [vmem:[#allocation2 + $0x8] sm:$0xff]  ;;  %v613_v60 = vshrl.u32 (!%p811_p6), %v612_v59, 7 }
  0x22   : > { %502 = vmatprep.subr.bf16.mxu0 %v862_v14  ;;  %545 = vmatprep.subr.bf16.mxu1 %v864_v15  ;;  %v288_v35 = vld [vmem:[#allocation2] sm:$0xff]  ;;  %v291_v38 = vld [vmem:[#allocation2 + $0x18] sm:$0xff]  ;;  %v294_v42 = vld [vmem:[#allocation2 + $0x30] sm:$0xff] }
  0x23   : > { %v292_v41 = vld [vmem:[#allocation2 + $0x20] sm:$0xff]  ;;  %v293_v47 = vld [vmem:[#allocation2 + $0x28] sm:$0xff]  ;;  %v295_v48 = vld [vmem:[#allocation2 + $0x38] sm:$0xff]  ;;  %v614_v63 = vsub.s32 (!%p811_p6), 0, %v613_v60  ;;  %v618_v1 = vsub.s32 (!%p811_p6), 1, %v613_v60  ;;  %v622_v2 = vsub.s32 (!%p811_p6), 2, %v613_v60 }
  0x24   : > { %v610_v61 = vld [vmem:[%s1044_s2] sm:$0xf] (!%p811_p6)  ;;  %v626_v3 = vsub.s32 (!%p811_p6), 3, %v613_v60 }
  0x25   : > { %503 = vmatpush1.bf16.msra.mxu0 %v866_v16  ;;  %546 = vmatpush1.bf16.msra.mxu1 %v867_v17  ;;  %v615_v7 = vrot.slane (!%p811_p6), %v610_v61, %v614_v63  ;;  %v619_v8 = vrot.slane (!%p811_p6), %v610_v61, %v618_v1  ;;  %v623_v9 = vrot.slane (!%p811_p6), %v610_v61, %v622_v2 }
  0x26   : > { %504 = vmatprep.subr.bf16.mxu0 %v868_v18  ;;  %547 = vmatprep.subr.bf16.mxu1 %v870_v19  ;;  %v627_v10 = vrot.slane (!%p811_p6), %v610_v61, %v626_v3 }
  0x29   : > { %505 = vmatpush1.bf16.msra.mxu0 %v872_v20  ;;  %548 = vmatpush1.bf16.msra.mxu1 %v873_v21 }
  0x2a   : > { %506 = vmatprep.subr.bf16.mxu0 %v874_v22  ;;  %549 = vmatprep.subr.bf16.mxu1 %v876_v23 }
  0x2d   : > { %507 = vmatpush1.bf16.msra.mxu0 %v878_v24  ;;  %550 = vmatpush1.bf16.msra.mxu1 %v879_v25 }
  0x2e   : > { %508 = vmatprep.subr.bf16.mxu0 %v880_v26  ;;  %551 = vmatprep.subr.bf16.mxu1 %v882_v27 }
  0x31   : > { %509 = vmatpush1.bf16.msra.mxu0 %v884_v28  ;;  %552 = vmatpush1.bf16.msra.mxu1 %v885_v29 }
  0x32   : > { %510 = vmatprep.subr.bf16.mxu0 %v886_v30  ;;  %553 = vmatprep.subr.bf16.mxu1 %v888_v31 }
  0x35   : > { %511 = vmatpush1.bf16.msra.mxu0 %v890_v32  ;;  %554 = vmatpush1.bf16.msra.mxu1 %v891_v33 }
  0x38   : > { %529 = vmatmul.mubr.bf16.vlgmr.msra.gmra.mrb[0].mxu0 %v892_v34  ;;  %572 = vmatmul.mubr.bf16.vlgmr.msra.gmra.mrb[0].mxu1 %v892_v34 }
 0x10b   : > { %v530_v39 = vpop.f32.mrb[0].mxu0  ;;  %v573_v40 = vpop.f32.mrb[0].mxu1  ;;  %601 = sbr.rel (%p811_p6) target bundleno = 284 (0x11c), region = 40 }
 0x10c   : > { %v582_v43 = vadd.f32 %v530_v39, %v288_v35  ;;  %v584_v44 = vadd.f32 %v573_v40, %v290_v36  ;;  %v532_v45 = vpop.f32.mrb[1].mxu0  ;;  %v575_v46 = vpop.f32.mrb[1].mxu1 }
 0x10d   : > { %v583_v49 = vadd.f32 %v532_v45, %v289_v37  ;;  %v585_v50 = vadd.f32 %v575_v46, %v291_v38  ;;  %v534_v51 = vpop.f32.mrb[2].mxu0  ;;  %v577_v52 = vpop.f32.mrb[2].mxu1 }
 0x10e   : > { %590 = vst [vmem:[#allocation2] sm:$0xff] %v582_v43  ;;  %592 = vst [vmem:[#allocation2 + $0x10] sm:$0xff] %v584_v44  ;;  %v586_v53 = vadd.f32 %v534_v51, %v292_v41  ;;  %v588_v54 = vadd.f32 %v577_v52, %v294_v42  ;;  %v536_v55 = vpop.f32.mrb[3].mxu0  ;;  %v579_v56 = vpop.f32.mrb[3].mxu1 }
 0x10f   : > { %591 = vst [vmem:[#allocation2 + $0x8] sm:$0xff] %v583_v49  ;;  %593 = vst [vmem:[#allocation2 + $0x18] sm:$0xff] %v585_v50  ;;  %v587_v57 = vadd.f32 %v536_v55, %v293_v47  ;;  %v589_v58 = vadd.f32 %v579_v56, %v295_v48 }
 0x110   : > { %594 = vst [vmem:[#allocation2 + $0x20] sm:$0xff] %v586_v53  ;;  %596 = vst [vmem:[#allocation2 + $0x30] sm:$0xff] %v588_v54 }
 0x111   : > { %595 = vst [vmem:[#allocation2 + $0x28] sm:$0xff] %v587_v57  ;;  %597 = vst [vmem:[#allocation2 + $0x38] sm:$0xff] %v589_v58 }
 0x115   : > { %v602_v62 = vld [vmem:[#allocation2] sm:$0xff]  ;;  %v604_v4 = vld [vmem:[#allocation2 + $0x10] sm:$0xff] }
 0x116   : > { %v603_v0 = vld [vmem:[#allocation2 + $0x8] sm:$0xff]  ;;  %v605_v5 = vld [vmem:[#allocation2 + $0x18] sm:$0xff]  ;;  %v632_v14 = vadd.f32 %v615_v7, %v602_v62  ;;  %v634_v16 = vadd.f32 %v623_v9, %v604_v4 }
 0x117   : > { %v606_v6 = vld [vmem:[#allocation2 + $0x20] sm:$0xff]  ;;  %v608_v12 = vld [vmem:[#allocation2 + $0x30] sm:$0xff]  ;;  %v633_v15 = vadd.f32 %v619_v8, %v603_v0  ;;  %v635_v17 = vadd.f32 %v627_v10, %v605_v5 }
 0x118   : > { %v607_v11 = vld [vmem:[#allocation2 + $0x28] sm:$0xff]  ;;  %v609_v13 = vld [vmem:[#allocation2 + $0x38] sm:$0xff]  ;;  %v636_v18 = vadd.f32 %v615_v7, %v606_v6  ;;  %v638_v20 = vadd.f32 %v623_v9, %v608_v12  ;;  %640 = vst [vmem:[%s1045_s3] sm:$0xff] %v632_v14  ;;  %642 = vst [vmem:[%s1045_s3 + $0x10] sm:$0xff] %v634_v16 }
 0x119   : > { %v637_v19 = vadd.f32 %v619_v8, %v607_v11  ;;  %v639_v21 = vadd.f32 %v627_v10, %v609_v13  ;;  %641 = vst [vmem:[%s1045_s3 + $0x8] sm:$0xff] %v633_v15  ;;  %643 = vst [vmem:[%s1045_s3 + $0x18] sm:$0xff] %v635_v17 }
 0x11a   : > { %644 = vst [vmem:[%s1045_s3 + $0x20] sm:$0xff] %v636_v18  ;;  %646 = vst [vmem:[%s1045_s3 + $0x30] sm:$0xff] %v638_v20 }
 0x11b   : > { %645 = vst [vmem:[%s1045_s3 + $0x28] sm:$0xff] %v637_v19  ;;  %647 = vst [vmem:[%s1045_s3 + $0x38] sm:$0xff] %v639_v21 }
 0x11c PF: > { %s13_s14 = sadd.s32 1, %s915_s14   ;;  %s1046_s12 = smov %s911_s13 }
 0x11d   : > { %p10_p7 = scmp.ge.s32.totalorder %s13_s14, 6   ;;  %s1047_s13 = smov %s1049_s15 }
 0x11f   :  { %12 = sbr.rel (!%p10_p7) target bundleno = 2 (0x2), region = 76 }

</bundles_post_ra>
